<compile_context>
chip_gen: v7x
topology: tpu7x:2x2x1
jax: 0.10.0
libtpu: 0.0.40
codegen_flags: <defaults>
</compile_context>

<pallas_src>
import functools

import jax
import jax.numpy as jnp
from jax import lax
from jax.experimental import pallas as pl
from jax.experimental.pallas import tpu as pltpu

_EPS = 1e-12
_LANES = 128
_SUBLANES = 8


def _l2_normalize(x, eps=_EPS):
    # Matches torch.nn.functional.normalize(x, p=2, dim=-1): x / max(||x||_2, eps)
    norm = jnp.sqrt(jnp.sum(x * x, axis=-1, keepdims=True))
    return x / jnp.maximum(norm, eps)


def _triplet_hard_kernel(a_ref, p_ref, n_ref, out_ref, *, margin, need_norm, b_true, tile_b):
    a = a_ref[...].astype(jnp.float32)   # (TB, D)
    p = p_ref[...].astype(jnp.float32)   # (TB, P, D)
    n = n_ref[...].astype(jnp.float32)   # (TB, N, D)

    # Raw dot products: broadcast multiply + lane reduction over D (VPU + XLU).
    pos_dot = jnp.sum(a[:, None, :] * p, axis=-1)   # (TB, P)
    neg_dot = jnp.sum(a[:, None, :] * n, axis=-1)   # (TB, N)

    if need_norm:
        # Deferred L2 normalization at reduced granularity.
        # rsqrt(max(||x||^2, eps^2)) == 1 / max(||x||, eps)  (torch normalize clamp).
        eps2 = jnp.float32(_EPS * _EPS)
        inv_a = lax.rsqrt(jnp.maximum(jnp.sum(a * a, axis=-1, keepdims=True), eps2))  # (TB, 1)
        inv_p = lax.rsqrt(jnp.maximum(jnp.sum(p * p, axis=-1), eps2))                 # (TB, P)
        inv_n = lax.rsqrt(jnp.maximum(jnp.sum(n * n, axis=-1), eps2))                 # (TB, N)
        pos_cos = pos_dot * inv_a * inv_p
        neg_cos = neg_dot * inv_a * inv_n
    else:
        pos_cos = pos_dot
        neg_cos = neg_dot

    # max(1 - pos_cos) - min(1 - neg_cos) == max(neg_cos) - min(pos_cos): the "1 -" cancels.
    min_pos = jnp.min(pos_cos, axis=-1, keepdims=True)       # (TB, 1)
    max_neg = jnp.max(neg_cos, axis=-1, keepdims=True)       # (TB, 1)
    per_row = jnp.maximum(max_neg - min_pos + margin, 0.0)   # (TB, 1)

    # Mask rows that only exist because the batch was padded to a multiple of TB.
    row_ids = pl.program_id(0) * tile_b + lax.broadcasted_iota(
        jnp.int32, (per_row.shape[0], 1), 0)
    partial = jnp.sum(jnp.where(row_ids < b_true, per_row, 0.0))

    # Lane/sublane-dense partial-sum tile (unmasked store).
    out_ref[...] = jnp.full((1, _SUBLANES, _LANES), partial, dtype=jnp.float32)


def triplet_hard_loss(anchor, positive, negative, margin=0.3, need_norm=True,
                      max_tile_b=512, vmem_budget_bytes=16 * 1024 * 1024):
    """Pallas implementation of TripletHardLoss.forward.

    anchor:   (B, D)
    positive: (B, P, D)
    negative: (B, N, D)
    returns:  scalar float32 loss
    """
    B, D = anchor.shape
    _, P, _ = positive.shape
    _, N, _ = negative.shape

    itemsize = jnp.dtype(anchor.dtype).itemsize
    row_bytes = (D + P * D + N * D) * itemsize

    # Batch tile: multiple of 8, double-buffered working set under the VMEM budget,
    # but never larger than needed for the (8-padded) batch.
    tb = (vmem_budget_bytes // (2 * row_bytes)) // _SUBLANES * _SUBLANES
    tb = int(max(_SUBLANES, min(tb, max_tile_b, pl.cdiv(B, _SUBLANES) * _SUBLANES)))

    b_pad = pl.cdiv(B, tb) * tb
    if b_pad != B:
        pad = b_pad - B
        anchor = jnp.pad(anchor, ((0, pad), (0, 0)))
        positive = jnp.pad(positive, ((0, pad), (0, 0), (0, 0)))
        negative = jnp.pad(negative, ((0, pad), (0, 0), (0, 0)))
    num_blocks = b_pad // tb

    kernel = functools.partial(
        _triplet_hard_kernel,
        margin=float(margin), need_norm=bool(need_norm), b_true=B, tile_b=tb)

    # Double-buffered inputs (2 * tb * row_bytes) with 2x headroom; clamp to stay
    # inside v7x's smaller VMEM while still covering the largest allowed tile.
    vmem_limit = int(min(max(4 * tb * row_bytes, 8 * 1024 * 1024), 32 * 1024 * 1024))

    partials = pl.pallas_call(
        kernel,
        out_shape=jax.ShapeDtypeStruct((num_blocks, _SUBLANES, _LANES), jnp.float32),
        grid=(num_blocks,),
        in_specs=[
            pl.BlockSpec((tb, D), lambda i: (i, 0)),
            pl.BlockSpec((tb, P, D), lambda i: (i, 0, 0)),
            pl.BlockSpec((tb, N, D), lambda i: (i, 0, 0)),
        ],
        out_specs=pl.BlockSpec((1, _SUBLANES, _LANES), lambda i: (i, 0, 0)),
        compiler_params=pltpu.CompilerParams(
            dimension_semantics=("parallel",),
            vmem_limit_bytes=vmem_limit,
        ),
    )(anchor, positive, negative)

    # Every lane/sublane of a block holds the same partial sum; take one and finish the mean.
    return jnp.sum(partials[:, 0, 0]) / jnp.float32(B)


def triplet_hard_loss_ref(anchor, positive, negative, margin=0.3, need_norm=True):
    # Pure-JAX reference (mirrors the PyTorch module) for correctness checking.
    if need_norm:
        anchor = _l2_normalize(anchor)
        positive = _l2_normalize(positive)
        negative = _l2_normalize(negative)
    pos_cos = jnp.einsum("bd,bnd->bn", anchor, positive)
    neg_cos = jnp.einsum("bd,bnd->bn", anchor, negative)
    pos_dist = 1.0 - pos_cos
    neg_dist = 1.0 - neg_cos
    loss = jax.nn.relu(pos_dist.max(-1) - neg_dist.min(-1) + margin)
    return loss.mean()


if __name__ == "__main__":
    key = jax.random.PRNGKey(0)
    k_a, k_p, k_n = jax.random.split(key, 3)

    B, P, N, D = 2, 4, 6, 32  # num_anchor, num_pos, num_neg, emb_dim
    anchor = jax.random.normal(k_a, (B, D), dtype=jnp.float32)
    positive = jax.random.normal(k_p, (B, P, D), dtype=jnp.float32)
    negative = jax.random.normal(k_n, (B, N, D), dtype=jnp.float32)

    loss = triplet_hard_loss(anchor, positive, negative, margin=0.3, need_norm=True)
    loss = jax.block_until_ready(loss)

    ref = triplet_hard_loss_ref(anchor, positive, negative, margin=0.3, need_norm=True)
    assert jnp.allclose(loss, ref, atol=1e-5, rtol=1e-5), (loss, ref)

    # Also exercise the non-normalized path and a batch large enough to tile (> TB, odd size).
    B2 = 37
    a2 = jax.random.normal(k_a, (B2, D), dtype=jnp.float32)
    p2 = jax.random.normal(k_p, (B2, P, D), dtype=jnp.float32)
    n2 = jax.random.normal(k_n, (B2, N, D), dtype=jnp.float32)
    for nn_flag in (True, False):
        got = jax.block_until_ready(
            triplet_hard_loss(a2, p2, n2, margin=0.3, need_norm=nn_flag, max_tile_b=16,
                              vmem_budget_bytes=64 * 1024))
        want = triplet_hard_loss_ref(a2, p2, n2, margin=0.3, need_norm=nn_flag)
        assert jnp.allclose(got, want, atol=1e-5, rtol=1e-5), (nn_flag, got, want)

    print("KERNEL_OK")
</pallas_src>

<mosaic_0001>
module attributes {stable_mosaic.version = 11 : i64} {
  func.func @_triplet_hard_kernel(%arg0: i32, %arg1: memref<8x32xf32, #tpu.memory_space<vmem>>, %arg2: memref<8x4x32xf32, #tpu.memory_space<vmem>>, %arg3: memref<8x6x32xf32, #tpu.memory_space<vmem>>, %arg4: memref<1x8x128xf32, #tpu.memory_space<vmem>>) attributes {dimension_semantics = [#tpu.dimension_semantics<parallel>], iteration_bounds = array<i64: 1>, scalar_prefetch = 0 : i64, scratch_operands = 0 : i64, tpu.core_type = #tpu.core_type<tc>, window_params = [{transform_indices = @transform_0, window_bounds = array<i64: 8, 32>}, {transform_indices = @transform_1, window_bounds = array<i64: 8, 4, 32>}, {transform_indices = @transform_2, window_bounds = array<i64: 8, 6, 32>}, {transform_indices = @transform_3, window_bounds = array<i64: 1, 8, 128>}]} {
    %c0 = arith.constant 0 : index
    %c0_0 = arith.constant 0 : index
    %0 = vector.load %arg1[%c0, %c0_0] : memref<8x32xf32, #tpu.memory_space<vmem>>, vector<8x32xf32>
    %c0_1 = arith.constant 0 : index
    %c0_2 = arith.constant 0 : index
    %c0_3 = arith.constant 0 : index
    %1 = vector.load %arg2[%c0_1, %c0_2, %c0_3] : memref<8x4x32xf32, #tpu.memory_space<vmem>>, vector<8x4x32xf32>
    %c0_4 = arith.constant 0 : index
    %c0_5 = arith.constant 0 : index
    %c0_6 = arith.constant 0 : index
    %2 = vector.load %arg3[%c0_4, %c0_5, %c0_6] : memref<8x6x32xf32, #tpu.memory_space<vmem>>, vector<8x6x32xf32>
    %3 = vector.shape_cast %0 : vector<8x32xf32> to vector<8x1x32xf32>
    %4 = vector.broadcast %3 : vector<8x1x32xf32> to vector<8x4x32xf32>
    %5 = arith.mulf %4, %1 : vector<8x4x32xf32>
    %cst = arith.constant dense<0.000000e+00> : vector<8x4xf32>
    %6 = vector.multi_reduction <add>, %5, %cst [2] : vector<8x4x32xf32> to vector<8x4xf32>
    %7 = vector.shape_cast %0 : vector<8x32xf32> to vector<8x1x32xf32>
    %8 = vector.broadcast %7 : vector<8x1x32xf32> to vector<8x6x32xf32>
    %9 = arith.mulf %8, %2 : vector<8x6x32xf32>
    %cst_7 = arith.constant dense<0.000000e+00> : vector<8x6xf32>
    %10 = vector.multi_reduction <add>, %9, %cst_7 [2] : vector<8x6x32xf32> to vector<8x6xf32>
    %11 = arith.mulf %0, %0 : vector<8x32xf32>
    %cst_8 = arith.constant dense<0.000000e+00> : vector<8xf32>
    %12 = vector.multi_reduction <add>, %11, %cst_8 [1] : vector<8x32xf32> to vector<8xf32>
    %13 = vector.shape_cast %12 : vector<8xf32> to vector<8x1xf32>
    %cst_9 = arith.constant 1.000000e-24 : f32
    %14 = vector.broadcast %cst_9 : f32 to vector<8x1xf32>
    %15 = arith.maximumf %13, %14 : vector<8x1xf32>
    %16 = math.rsqrt %15 : vector<8x1xf32>
    %17 = arith.mulf %1, %1 : vector<8x4x32xf32>
    %cst_10 = arith.constant dense<0.000000e+00> : vector<8x4xf32>
    %18 = vector.multi_reduction <add>, %17, %cst_10 [2] : vector<8x4x32xf32> to vector<8x4xf32>
    %cst_11 = arith.constant 1.000000e-24 : f32
    %19 = vector.broadcast %cst_11 : f32 to vector<8x4xf32>
    %20 = arith.maximumf %18, %19 : vector<8x4xf32>
    %21 = math.rsqrt %20 : vector<8x4xf32>
    %22 = arith.mulf %2, %2 : vector<8x6x32xf32>
    %cst_12 = arith.constant dense<0.000000e+00> : vector<8x6xf32>
    %23 = vector.multi_reduction <add>, %22, %cst_12 [2] : vector<8x6x32xf32> to vector<8x6xf32>
    %cst_13 = arith.constant 1.000000e-24 : f32
    %24 = vector.broadcast %cst_13 : f32 to vector<8x6xf32>
    %25 = arith.maximumf %23, %24 : vector<8x6xf32>
    %26 = math.rsqrt %25 : vector<8x6xf32>
    %27 = vector.broadcast %16 : vector<8x1xf32> to vector<8x4xf32>
    %28 = arith.mulf %6, %27 : vector<8x4xf32>
    %29 = arith.mulf %28, %21 : vector<8x4xf32>
    %30 = vector.broadcast %16 : vector<8x1xf32> to vector<8x6xf32>
    %31 = arith.mulf %10, %30 : vector<8x6xf32>
    %32 = arith.mulf %31, %26 : vector<8x6xf32>
    %cst_14 = arith.constant dense<0x7F800000> : vector<8xf32>
    %33 = vector.multi_reduction <minimumf>, %29, %cst_14 [1] : vector<8x4xf32> to vector<8xf32>
    %34 = vector.shape_cast %33 : vector<8xf32> to vector<8x1xf32>
    %cst_15 = arith.constant dense<0xFF800000> : vector<8xf32>
    %35 = vector.multi_reduction <maximumf>, %32, %cst_15 [1] : vector<8x6xf32> to vector<8xf32>
    %36 = vector.shape_cast %35 : vector<8xf32> to vector<8x1xf32>
    %37 = arith.subf %36, %34 : vector<8x1xf32>
    %cst_16 = arith.constant 3.000000e-01 : f32
    %38 = vector.broadcast %cst_16 : f32 to vector<8x1xf32>
    %39 = arith.addf %37, %38 : vector<8x1xf32>
    %cst_17 = arith.constant 0.000000e+00 : f32
    %40 = vector.broadcast %cst_17 : f32 to vector<8x1xf32>
    %41 = arith.maximumf %39, %40 : vector<8x1xf32>
    %c8_i32 = arith.constant 8 : i32
    %42 = arith.muli %arg0, %c8_i32 : i32
    %43 = tpu.iota {dimensions = array<i32: 0>} : vector<8x1xi32>
    %44 = vector.broadcast %42 : i32 to vector<8x1xi32>
    %45 = arith.addi %44, %43 : vector<8x1xi32>
    %c2_i32 = arith.constant 2 : i32
    %46 = vector.broadcast %c2_i32 : i32 to vector<8x1xi32>
    %47 = arith.cmpi slt, %45, %46 : vector<8x1xi32>
    %cst_18 = arith.constant 0.000000e+00 : f32
    %48 = vector.broadcast %cst_18 : f32 to vector<8x1xf32>
    %49 = arith.select %47, %41, %48 : vector<8x1xi1>, vector<8x1xf32>
    %50 = vector.shape_cast %49 : vector<8x1xf32> to vector<1x8x1xf32>
    %cst_19 = arith.constant dense<0.000000e+00> : vector<1xf32>
    %51 = vector.multi_reduction <add>, %50, %cst_19 [1, 2] : vector<1x8x1xf32> to vector<1xf32>
    %52 = vector.shape_cast %51 : vector<1xf32> to vector<1x1x1xf32>
    %53 = vector.extract %52[0, 0, 0] : f32 from vector<1x1x1xf32>
    %54 = vector.broadcast %53 : f32 to vector<1x8x128xf32>
    %c0_20 = arith.constant 0 : index
    %c0_21 = arith.constant 0 : index
    %c0_22 = arith.constant 0 : index
    %55 = vector.load %arg4[%c0_20, %c0_21, %c0_22] : memref<1x8x128xf32, #tpu.memory_space<vmem>>, vector<1x8x128xf32>
    tpu.vector_store %arg4[%c0_20, %c0_21, %c0_22], %54 {strides = array<i32>} : memref<1x8x128xf32, #tpu.memory_space<vmem>>, vector<1x8x128xf32>,
    return
  }
  func.func @transform_0(%arg0: i32) -> (i32, i32) {
    %c0_i32 = arith.constant 0 : i32
    %c0_i32_0 = arith.constant 0 : i32
    return %arg0, %c0_i32 : i32, i32
  }
  func.func @transform_1(%arg0: i32) -> (i32, i32, i32) {
    %c0_i32 = arith.constant 0 : i32
    %c0_i32_0 = arith.constant 0 : i32
    %c0_i32_1 = arith.constant 0 : i32
    return %arg0, %c0_i32, %c0_i32_0 : i32, i32, i32
  }
  func.func @transform_2(%arg0: i32) -> (i32, i32, i32) {
    %c0_i32 = arith.constant 0 : i32
    %c0_i32_0 = arith.constant 0 : i32
    %c0_i32_1 = arith.constant 0 : i32
    return %arg0, %c0_i32, %c0_i32_0 : i32, i32, i32
  }
  func.func @transform_3(%arg0: i32) -> (i32, i32, i32) {
    %c0_i32 = arith.constant 0 : i32
    %c0_i32_0 = arith.constant 0 : i32
    %c0_i32_1 = arith.constant 0 : i32
    return %arg0, %c0_i32, %c0_i32_0 : i32, i32, i32
  }
}

</mosaic_0001>

<bundles_post_ra>
// kernel: tpu_custom_call.1
= control target key start
LH: loop header
LB: loop body
LE: loop exit
PB: predicated region body
PF: predicated region fallthrough
CT: control target
= control target key end

     0   :  { %vm130_vm0 = vcmask 257024   ;;  %vm189_vm1 = vcmask 261120   ;;  %vm163_vm2 = vcmask 259072   ;;  %v628_v12 = vmov 1966171168   ;;  %s909_s0 = inlined_call_operand.vmem [shape: f32[8,32], index: 0, kind: input, shape index: {}]   ;;  %s910_s1 = inlined_call_operand.vmem [shape: f32[8,4,32], index: 1, kind: input, shape index: {}]   ;;  %s911_s2 = inlined_call_operand.vmem [shape: f32[8,6,32], index: 2, kind: input, shape index: {}]   ;;  %s912_s3 = inlined_call_operand.hbm [shape: f32[1,8,128], index: 3, kind: output, shape index: {}]  }
   0x1   :  { %v654_v0 = vld [vmem:[%s910_s1 + $0x4] sm:$0xf]  ;;  %v673_v5 = vld [vmem:[%s910_s1] sm:$0xf]  ;;  %v680_v7 = vld [vmem:[%s910_s1 + $0x8] sm:$0xf]  ;;  %v35_v13 = vunpack.c.l.s4 %v628_v12  ;;  %v37_v14 = vlaneseq }
   0x2   :  { %v659_v1 = vld [vmem:[%s909_s0] sm:$0xff]  ;;  %v196_v2 = vmul.f32 %v654_v0, %v654_v0  ;;  %v685_v8 = vld [vmem:[%s911_s2 + $0x8] sm:$0x3f]  ;;  %v195_v11 = vmul.f32 %v673_v5, %v673_v5  ;;  %v197_v17 = vmul.f32 %v680_v7, %v680_v7  ;;  %v704_v20 = vld [vmem:[%s911_s2 + $0x10] sm:$0x3f] }
   0x3   :  { %v188_v3 = vmul.f32 %v659_v1, %v659_v1  ;;  %v668_v4 = vld [vmem:[%s911_s2] sm:$0x3f]  ;;  %v244_v18 = vmul.f32 %v685_v8, %v685_v8  ;;  %v699_v19 = vld [vmem:[%s910_s1 + $0xc] sm:$0xf]  ;;  %v36_v21 = vunpack.c.0.s8 %v35_v13  ;;  %v707_v22 = vshrl.u32 %v37_v14, 7 }
   0x4   :  { %v243_v6 = vmul.f32 %v668_v4, %v668_v4  ;;  %v206_v9 = vsel %vm130_vm0, %v196_v2, 0.0  ;;  %v203_v16 = vsel %vm130_vm0, %v195_v11, 0.0  ;;  %v209_v23 = vsel %vm130_vm0, %v197_v17, 0.0 }
   0x5   :  { %v190_v10 = vsel %vm189_vm1, %v188_v3, 0.0  ;;  %207 = vadd.xlane.f32.xlu1 %v206_v9  ;;  %v254_v24 = vsel %vm163_vm2, %v244_v18, 0.0  ;;  %v198_v25 = vmul.f32 %v699_v19, %v699_v19  ;;  %v245_v26 = vmul.f32 %v704_v20, %v704_v20 }
   0x6   :  { %191 = vadd.xlane.f32.xlu0 %v190_v10  ;;  %v251_v15 = vsel %vm163_vm2, %v243_v6, 0.0 }
   0x9   :  { %252 = vadd.xlane.f32.xlu1 %v251_v15 }
   0xa   :  { %204 = vadd.xlane.f32.xlu0 %v203_v16 }
   0xb   :  { %8 = vsyncpa [#allocation3], 0  ;;  %v718_v27 = vld [vmem:[%s910_s1 + $0x10] sm:$0xf]  ;;  %v723_v28 = vld [vmem:[%s911_s2 + $0x18] sm:$0x3f]  ;;  %v726_v29 = vsub.s32 %v36_v21, %v707_v22  ;;  %v33_v59 = vcombine.high %v659_v1, %v659_v1 }
   0xc   :  { %v212_v30 = vsel %vm130_vm0, %v198_v25, 0.0  ;;  %v257_v31 = vsel %vm163_vm2, %v245_v26, 0.0  ;;  %v199_v32 = vmul.f32 %v718_v27, %v718_v27  ;;  %v246_v33 = vmul.f32 %v723_v28, %v723_v28  ;;  %v737_v34 = vld [vmem:[%s910_s1 + $0x14] sm:$0xf]  ;;  %v742_v35 = vld [vmem:[%s911_s2 + $0x20] sm:$0x3f] }
   0xd   :  { %210 = vadd.xlane.f32.xlu1 %v209_v23  ;;  %v40_v36 = vrot.slane %v659_v1, %v726_v29  ;;  %v200_v39 = vmul.f32 %v737_v34, %v737_v34  ;;  %v247_v40 = vmul.f32 %v742_v35, %v742_v35  ;;  %v755_v41 = vld [vmem:[%s910_s1 + $0x18] sm:$0xf]  ;;  %v760_v42 = vld [vmem:[%s911_s2 + $0x28] sm:$0x3f]  ;;  %v769_v46 = vld [vmem:[%s910_s1 + $0x1c] sm:$0xf]  ;;  %v47_v6 = vrot.slane %v33_v59, %v726_v29 }
   0xe   :  { %255 = vadd.xlane.f32.xlu0 %v254_v24  ;;  %v215_v37 = vsel %vm130_vm0, %v199_v32, 0.0  ;;  %v260_v38 = vsel %vm163_vm2, %v246_v33, 0.0  ;;  %v201_v44 = vmul.f32 %v755_v41, %v755_v41  ;;  %v248_v45 = vmul.f32 %v760_v42, %v760_v42  ;;  %v776_v49 = vld [vmem:[%s911_s2 + $0x30] sm:$0x3f]  ;;  %v791_v56 = vld [vmem:[%s911_s2 + $0x38] sm:$0x3f] }
   0xf   :  { %v48_v43 = vcombine.high %v40_v36, %v40_v36  ;;  %v218_v47 = vsel %vm130_vm0, %v200_v39, 0.0  ;;  %v263_v48 = vsel %vm163_vm2, %v247_v40, 0.0  ;;  %v56_v50 = vrot.slane %v40_v36, %v726_v29  ;;  %s630_s2 = smov [#allocation2]  }
  0x10   :  { %v780_v51 = vsub.s32 0, %v707_v22  ;;  %v202_v52 = vmul.f32 %v769_v46, %v769_v46  ;;  %v249_v53 = vmul.f32 %v776_v49, %v776_v49  ;;  %v221_v54 = vsel %vm130_vm0, %v201_v44, 0.0  ;;  %s554_s17 = sshll.u32 %s630_s2, 4  ;;  %s555_s17 = int_to_ptr.vmem [resolvable:$true] %s554_s17 }
  0x11   :  { %213 = vadd.xlane.f32.xlu1 %v212_v30  ;;  %v266_v55 = vsel %vm163_vm2, %v248_v45, 0.0  ;;  %v70_v58 = vrot.slane %v48_v43, %v726_v29  ;;  %v250_v60 = vmul.f32 %v791_v56, %v791_v56  ;;  %v78_v61 = vcombine.high %v56_v50, %v56_v50  ;;  %s604_s19 = scalar_lea.vmem %s555_s17, 128  ;;  %p609_p1 = scmp.lt.s32.totalorder %s555_s17, %s555_s17 }
  0x12   :  { %258 = vadd.xlane.f32.xlu0 %v257_v31  ;;  %v85_v57 = vrot.slane %v56_v50, %v780_v51  ;;  %v224_v62 = vsel %vm130_vm0, %v202_v52, 0.0  ;;  %v269_v63 = vsel %vm163_vm2, %v249_v53, 0.0  ;;  %v63_v15 = vrot.slane %v47_v6, %v726_v29  ;;  %p605_p0 = scmp.ne.s32.totalorder %s555_s17, %s604_s19  ;;  %p610_p2 = scmp.lt.s32.totalorder %s604_s19, %s604_s19 }
  0x13   :  { %v89_v3 = vrot.slane %v70_v58, %v780_v51  ;;  %v272_v1 = vsel %vm163_vm2, %v250_v60, 0.0  ;;  %v93_v9 = vrot.slane %v78_v61, %v780_v51  ;;  %v80_v13 = vcombine.high %v70_v58, %v70_v58 }
  0x14   :  { %v122_v2 = vmul.f32 %v85_v57, %v673_v5  ;;  %v155_v11 = vmul.f32 %v85_v57, %v668_v4  ;;  %v49_v16 = vcombine.high %v47_v6, %v47_v6  ;;  %v79_v30 = vcombine.high %v63_v15, %v63_v15  ;;  %p611_p3 = por %p610_p2, %p609_p1 }
  0x15   :  { %216 = vadd.xlane.f32.xlu1 %v215_v37  ;;  %v123_v12 = vmul.f32 %v89_v3, %v654_v0  ;;  %v124_v5 = vmul.f32 %v93_v9, %v680_v7  ;;  %v156_v21 = vmul.f32 %v89_v3, %v685_v8  ;;  %v97_v23 = vrot.slane %v80_v13, %v780_v51 }
  0x16   :  { %261 = vadd.xlane.f32.xlu0 %v260_v38  ;;  %v131_v10 = vsel %vm130_vm0, %v122_v2, 0.0  ;;  %v164_v17 = vsel %vm163_vm2, %v155_v11, 0.0  ;;  %v101_v0 = vrot.slane %v63_v15, %v780_v51  ;;  %v77_v4 = vrot.slane %v49_v16, %v726_v29  ;;  %p612_p4 = pnand %p611_p3, %p605_p0 }
  0x17   :  { %v134_v18 = vsel %vm130_vm0, %v123_v12, 0.0  ;;  %v137_v24 = vsel %vm130_vm0, %v124_v5, 0.0  ;;  %v167_v7 = vsel %vm163_vm2, %v156_v21, 0.0  ;;  %v157_v25 = vmul.f32 %v93_v9, %v704_v20 }
  0x18   :  { %v125_v26 = vmul.f32 %v97_v23, %v699_v19  ;;  %v126_v8 = vmul.f32 %v101_v0, %v718_v27  ;;  %v158_v33 = vmul.f32 %v97_v23, %v723_v28  ;;  %v105_v29 = vrot.slane %v77_v4, %v780_v51 }
  0x19   :  { %219 = vadd.xlane.f32.xlu1 %v218_v47  ;;  %v170_v31 = vsel %vm163_vm2, %v157_v25, 0.0  ;;  %v159_v20 = vmul.f32 %v101_v0, %v742_v35  ;;  %v109_v27 = vrot.slane %v79_v30, %v780_v51  ;;  %v81_v38 = vcombine.high %v77_v4, %v77_v4 }
  0x1a   :  { %264 = vadd.xlane.f32.xlu0 %v263_v48  ;;  %v140_v32 = vsel %vm130_vm0, %v125_v26, 0.0  ;;  %v143_v36 = vsel %vm130_vm0, %v126_v8, 0.0  ;;  %v173_v19 = vsel %vm163_vm2, %v158_v33, 0.0  ;;  %v127_v37 = vmul.f32 %v105_v29, %v737_v34 }
  0x1b   :  { %v176_v39 = vsel %vm163_vm2, %v159_v20, 0.0  ;;  %v160_v40 = vmul.f32 %v105_v29, %v760_v42  ;;  %v128_v43 = vmul.f32 %v109_v27, %v755_v41  ;;  %v113_v44 = vrot.slane %v81_v38, %v780_v51 }
  0x1c   :  { %v146_v28 = vsel %vm130_vm0, %v127_v37, 0.0  ;;  %v629_v35 = vmov 0   ;;  %v161_v47 = vmul.f32 %v109_v27, %v776_v49  ;;  %v298_v15 = vsub.s32 1, %v707_v22 }
  0x1d   :  { %222 = vadd.xlane.f32.xlu1 %v221_v54  ;;  %568 = vset.pattern.permute.xlu0 %v629_v35  ;;  %v179_v34 = vsel %vm163_vm2, %v160_v40, 0.0  ;;  %v149_v45 = vsel %vm130_vm0, %v128_v43, 0.0  ;;  %v129_v48 = vmul.f32 %v113_v44, %v769_v46  ;;  %v162_v50 = vmul.f32 %v113_v44, %v791_v56 }
  0x1e   :  { %267 = vadd.xlane.f32.xlu0 %v266_v55  ;;  %567 = vset.pattern.permute.xlu1 %v629_v35  ;;  %v182_v42 = vsel %vm163_vm2, %v161_v47, 0.0  ;;  %v314_v47 = vsub.s32 5, %v707_v22  ;;  %vm430_vm3 = vcmask 1041409   ;;  %vm432_vm4 = vcmask 1042434  }
  0x1f   :  { %v152_v41 = vsel %vm130_vm0, %v129_v48, 0.0  ;;  %v185_v52 = vsel %vm163_vm2, %v162_v50, 0.0  ;;  %vm434_vm5 = vcmask 1043459   ;;  %vm436_vm6 = vcmask 1044484  }
  0x20   :  { %vm438_vm7 = vcmask 1045509   ;;  %vm440_vm8 = vcmask 1046534   ;;  %vm442_vm9 = vcmask 1047559   ;;  %vm445_vm10 = vcmask 31744  }
  0x21   :  { %225 = vadd.xlane.f32.xlu1 %v224_v62  ;;  %vm521_vm11 = vcmask 48128   ;;  %vm533_vm12 = vcmp.lt.s32.totalorder %v707_v22, 2  ;;  %vm535_vm13 = vcmask 7168  }
  0x22   :  { %270 = vadd.xlane.f32.xlu0 %v269_v63 }
  0x25   :  { %132 = vadd.xlane.f32.xlu1 %v131_v10 }
  0x26   :  { %273 = vadd.xlane.f32.xlu0 %v272_v1 }
  0x29   :  { %165 = vadd.xlane.f32.xlu1 %v164_v17 }
  0x2a   :  { %135 = vadd.xlane.f32.xlu0 %v134_v18 }
  0x2d   :  { %138 = vadd.xlane.f32.xlu1 %v137_v24 }
  0x2e   :  { %168 = vadd.xlane.f32.xlu0 %v167_v7 }
  0x31   :  { %141 = vadd.xlane.f32.xlu1 %v140_v32 }
  0x32   :  { %171 = vadd.xlane.f32.xlu0 %v170_v31 }
  0x35   :  { %144 = vadd.xlane.f32.xlu1 %v143_v36 }
  0x36   :  { %174 = vadd.xlane.f32.xlu0 %v173_v19 }
  0x39   :  { %147 = vadd.xlane.f32.xlu1 %v146_v28 }
  0x3a   :  { %177 = vadd.xlane.f32.xlu0 %v176_v39 }
  0x3d   :  { %150 = vadd.xlane.f32.xlu1 %v149_v45 }
  0x3e   :  { %180 = vadd.xlane.f32.xlu0 %v179_v34  ;;  %v310_v34 = vsub.s32 4, %v707_v22 }
  0x41   :  { %153 = vadd.xlane.f32.xlu1 %v152_v41 }
  0x42   :  { %183 = vadd.xlane.f32.xlu0 %v182_v42 }
  0x46   :  { %186 = vadd.xlane.f32.xlu0 %v185_v52 }
  0x92   :  { %v208_v53 = vpop.xlane.xlu1 %207 }
  0x93   :  { %v192_v54 = vpop.xlane.xlu0 %191  ;;  %v228_v3 = vmax.f32 %v208_v53, 1e-24 }
  0x94   :  { %v193_v60 = vmax.f32 %v192_v54, 1e-24 }
  0x96   :  { %v253_v55 = vpop.xlane.xlu1 %252  ;;  %570 = vrsqrt.f32 %v193_v60 }
  0x97   :  { %v205_v57 = vpop.xlane.xlu0 %204  ;;  %v275_v6 = vmax.f32 %v253_v55, 1e-24 }
  0x98   :  { %v227_v56 = vmax.f32 %v205_v57, 1e-24  ;;  %v318_v57 = vsub.s32 6, %v707_v22 }
  0x9a   :  { %v211_v49 = vpop.xlane.xlu1 %210  ;;  %572 = vrsqrt.f32 %v227_v56 }
  0x9b   :  { %v256_v58 = vpop.xlane.xlu0 %255  ;;  %574 = vrsqrt.f32 %v228_v3  ;;  %v229_v16 = vmax.f32 %v211_v49, 1e-24 }
  0x9c   :  { %576 = vrsqrt.f32 %v275_v6  ;;  %v276_v11 = vmax.f32 %v256_v58, 1e-24  ;;  %v322_v6 = vsub.s32 7, %v707_v22 }
  0x9e   :  { %v844_v46 = vpop.xlane.xlu1 %213  ;;  %578 = vrsqrt.f32 %v276_v11 }
  0x9f   :  { %v259_v59 = vpop.xlane.xlu0 %258  ;;  %580 = vrsqrt.f32 %v229_v16 }
  0xa0   :  { %v850_v10 = vpop.eup %570  ;;  %v277_v24 = vmax.f32 %v259_v59, 1e-24 }
  0xa1   :  { %v295_v5 = vrot.slane %v850_v10, %v780_v51  ;;  %v299_v4 = vrot.slane %v850_v10, %v298_v15  ;;  %v302_v51 = vsub.s32 2, %v707_v22  ;;  %v311_v54 = vrot.slane %v850_v10, %v310_v34 }
  0xa2   :  { %v217_v61 = vpop.xlane.xlu1 %216  ;;  %582 = vrsqrt.f32 %v277_v24  ;;  %v315_v59 = vrot.slane %v850_v10, %v314_v47  ;;  %v323_v24 = vrot.slane %v850_v10, %v322_v6 }
  0xa3   :  { %v846_v62 = vpop.xlane.xlu0 %261  ;;  %v231_v32 = vmax.f32 %v217_v61, 1e-24  ;;  %v303_v37 = vrot.slane %v850_v10, %v302_v51 }
  0xa4   :  { %v573_v23 = vpop.eup %572 }
  0xa5   :  { %v575_v26 = vpop.eup %574  ;;  %584 = vrsqrt.f32 %v231_v32 }
  0xa6   :  { %v220_v63 = vpop.xlane.xlu1 %219  ;;  %v577_v31 = vpop.eup %576 }
  0xa7   :  { %v265_v2 = vpop.xlane.xlu0 %264  ;;  %v232_v36 = vmax.f32 %v220_v63, 1e-24 }
  0xa8   :  { %v579_v38 = vpop.eup %578  ;;  %v279_v39 = vmax.f32 %v265_v2, 1e-24 }
  0xa9   :  { %586 = vrsqrt.f32 %v232_v36  ;;  %v581_v45 = vpop.eup %580 }
  0xaa   :  { %v223_v1 = vpop.xlane.xlu1 %222  ;;  %588 = vrsqrt.f32 %v279_v39 }
  0xab   :  { %v848_v9 = vpop.xlane.xlu0 %267  ;;  %v233_v43 = vmax.f32 %v223_v1, 1e-24 }
  0xac   :  { %v280_v48 = vmax.f32 %v848_v9, 1e-24  ;;  %v583_v55 = vpop.eup %582 }
  0xad   :  { %590 = vrsqrt.f32 %v233_v43 }
  0xae   :  { %v226_v12 = vpop.xlane.xlu1 %225  ;;  %592 = vrsqrt.f32 %v280_v48 }
  0xaf   :  { %v852_v13 = vpop.xlane.xlu0 %270  ;;  %v234_v50 = vmax.f32 %v226_v12, 1e-24  ;;  %v585_v63 = vpop.eup %584  ;;  %v319_v12 = vrot.slane %v850_v10, %v318_v57 }
  0xb0   :  { %v281_v60 = vmax.f32 %v852_v13, 1e-24 }
  0xb1   :  { %594 = vrsqrt.f32 %v234_v50 }
  0xb2   :  { %v133_v18 = vpop.xlane.xlu1 %132  ;;  %596 = vrsqrt.f32 %v281_v60 }
  0xb3   :  { %v857_v17 = vpop.xlane.xlu0 %273  ;;  %v332_v21 = vmul.f32 %v295_v5, %v133_v18  ;;  %v587_v3 = vpop.eup %586 }
  0xb4   :  { %v589_v18 = vpop.eup %588 }
  0xb5   :  { %v340_v0 = vmul.f32 %v573_v23, %v332_v21 }
  0xb6   :  { %v166_v7 = vpop.xlane.xlu1 %165 }
  0xb7   :  { %v136_v25 = vpop.xlane.xlu0 %135  ;;  %v348_v8 = vmul.f32 %v295_v5, %v166_v7  ;;  %373 = vperm.xlu1 %567, %v340_v0   ;;  %v230_v5 = vmax.f32 %v844_v46, 1e-24  ;;  %v591_v21 = vpop.eup %590  ;;  %v278_v7 = vmax.f32 %v846_v62, 1e-24  ;;  %v306_v46 = vsub.s32 3, %v707_v22 }
  0xb8   :  { %v333_v30 = vmul.f32 %v299_v4, %v136_v25 }
  0xb9   :  { %v356_v33 = vmul.f32 %v577_v31, %v348_v8  ;;  %598 = vrsqrt.f32 %v230_v5  ;;  %v593_v8 = vpop.eup %592  ;;  %v307_v36 = vrot.slane %v850_v10, %v306_v46 }
  0xba   :  { %v341_v29 = vmul.f32 %v575_v26, %v333_v30  ;;  %v139_v20 = vpop.xlane.xlu1 %138  ;;  %600 = vrsqrt.f32 %v278_v7 }
  0xbb   :  { %v169_v19 = vpop.xlane.xlu0 %168  ;;  %458 = vperm.xlu1 %567, %v356_v33   ;;  %v334_v28 = vmul.f32 %v303_v37, %v139_v20  ;;  %v595_v51 = vpop.eup %594 }
  0xbc   :  { %v349_v27 = vmul.f32 %v299_v4, %v169_v19  ;;  %376 = vperm.xlu0 %568, %v341_v29   ;;  %v282_v29 = vmax.f32 %v857_v17, 1e-24  ;;  %v597_v62 = vpop.eup %596 }
  0xbd   :  { %v342_v42 = vmul.f32 %v581_v45, %v334_v28 }
  0xbe   :  { %v357_v40 = vmul.f32 %v579_v38, %v349_v27  ;;  %v862_v35 = vpop.xlane.xlu1 %141  ;;  %602 = vrsqrt.f32 %v282_v29 }
  0xbf   :  { %v172_v44 = vpop.xlane.xlu0 %171  ;;  %v335_v20 = vmul.f32 %v307_v36, %v862_v35 }
  0xc0   :  { %461 = vperm.xlu1 %567, %v357_v40   ;;  %v350_v41 = vmul.f32 %v303_v37, %v172_v44 }
  0xc2   :  { %v145_v53 = vpop.xlane.xlu1 %144  ;;  %v358_v49 = vmul.f32 %v583_v55, %v350_v41 }
  0xc3   :  { %v175_v52 = vpop.xlane.xlu0 %174  ;;  %v336_v58 = vmul.f32 %v311_v54, %v145_v53  ;;  %v599_v37 = vpop.eup %598 }
  0xc4   :  { %379 = vperm.xlu1 %567, %v342_v42   ;;  %v343_v27 = vmul.f32 %v599_v37, %v335_v20  ;;  %v351_v38 = vmul.f32 %v307_v36, %v175_v52  ;;  %v601_v28 = vpop.eup %600  ;;  %v397_v52 = vand.u32 127, %v37_v14 }
  0xc5   :  { %v344_v1 = vmul.f32 %v585_v63, %v336_v58 }
  0xc6   :  { %v148_v56 = vpop.xlane.xlu1 %147  ;;  %v359_v40 = vmul.f32 %v601_v28, %v351_v38 }
  0xc7   :  { %v178_v61 = vpop.xlane.xlu0 %177  ;;  %v337_v2 = vmul.f32 %v315_v59, %v148_v56 }
  0xc8   :  { %464 = vperm.xlu1 %567, %v358_v49   ;;  %v352_v9 = vmul.f32 %v311_v54, %v178_v61  ;;  %v603_v17 = vpop.eup %602  ;;  %v400_v54 = vsub.s32 %v397_v52, %v707_v22 }
  0xc9   :  { %v345_v11 = vmul.f32 %v587_v3, %v337_v2 }
  0xca   :  { %v151_v16 = vpop.xlane.xlu1 %150  ;;  %v360_v23 = vmul.f32 %v589_v18, %v352_v9 }
  0xcb   :  { %v181_v15 = vpop.xlane.xlu0 %180  ;;  %v338_v13 = vmul.f32 %v319_v12, %v151_v16  ;;  %388 = vperm.xlu0 %568, %v345_v11  }
  0xcc   :  { %385 = vperm.xlu1 %567, %v344_v1   ;;  %v353_v0 = vmul.f32 %v315_v59, %v181_v15 }
  0xcd   :  { %v346_v4 = vmul.f32 %v591_v21, %v338_v13 }
  0xce   :  { %v154_v26 = vpop.xlane.xlu1 %153  ;;  %v361_v31 = vmul.f32 %v593_v8, %v353_v0 }
  0xcf   :  { %v184_v25 = vpop.xlane.xlu0 %183  ;;  %v339_v30 = vmul.f32 %v323_v24, %v154_v26  ;;  %391 = vperm.xlu0 %568, %v346_v4  }
  0xd0   :  { %470 = vperm.xlu1 %567, %v360_v23   ;;  %v354_v32 = vmul.f32 %v319_v12, %v184_v25 }
  0xd1   :  { %v347_v33 = vmul.f32 %v595_v51, %v339_v30 }
  0xd2   :  { %v362_v19 = vmul.f32 %v597_v62, %v354_v32 }
  0xd3   :  { %394 = vperm.xlu0 %568, %v347_v33   ;;  %v187_v39 = vpop.xlane.xlu0 %186 }
  0xd4   :  { %473 = vperm.xlu1 %567, %v361_v31   ;;  %v355_v43 = vmul.f32 %v323_v24, %v187_v39 }
  0xd6   :  { %v363_v44 = vmul.f32 %v603_v17, %v355_v43 }
  0xd8   :  { %476 = vperm.xlu1 %567, %v362_v19  }
  0xdc   :  { %382 = vperm.xlu1 %567, %v343_v27  }
  0xe0   :  { %467 = vperm.xlu1 %567, %v359_v40  }
  0xe4   :  { %479 = vperm.xlu1 %567, %v363_v44  }
 0x136   :  { %v374_v10 = vpop.permute.xlu1 %373 }
 0x137   :  { %v401_v59 = vrot.slane %v374_v10, %v400_v54 }
 0x13a   :  { %v459_v34 = vpop.permute.xlu1 %458 }
 0x13b   :  { %v377_v42 = vpop.permute.xlu0 %376  ;;  %v484_v1 = vrot.slane %v459_v34, %v400_v54 }
 0x13c   :  { %v405_v49 = vrot.slane %v377_v42, %v400_v54 }
 0x13e   :  { %v431_v61 = vsel %vm430_vm3, %v405_v49, %v401_v59 }
 0x13f   :  { %v462_v45 = vpop.permute.xlu1 %461 }
 0x140   :  { %v488_v56 = vrot.slane %v462_v45, %v400_v54 }
 0x142   :  { %v513_v16 = vsel %vm430_vm3, %v488_v56, %v484_v1 }
 0x143   :  { %v380_v47 = vpop.permute.xlu1 %379 }
 0x144   :  { %v409_v58 = vrot.slane %v380_v47, %v400_v54 }
 0x146   :  { %v433_v2 = vsel %vm432_vm4, %v409_v58, %v431_v61 }
 0x147   :  { %v465_v35 = vpop.permute.xlu1 %464 }
 0x148   :  { %v492_v14 = vrot.slane %v465_v35, %v400_v54 }
 0x14a   :  { %v389_v50 = vpop.permute.xlu0 %388  ;;  %v514_v23 = vsel %vm432_vm4, %v492_v14, %v513_v16 }
 0x14b   :  { %v386_v48 = vpop.permute.xlu1 %385  ;;  %v421_v9 = vrot.slane %v389_v50, %v400_v54 }
 0x14c   :  { %v417_v3 = vrot.slane %v386_v48, %v400_v54 }
 0x14e   :  { %v392_v55 = vpop.permute.xlu0 %391 }
 0x14f   :  { %v471_v41 = vpop.permute.xlu1 %470  ;;  %v425_v12 = vrot.slane %v392_v55, %v400_v54 }
 0x150   :  { %v500_v0 = vrot.slane %v471_v41, %v400_v54 }
 0x152   :  { %v395_v6 = vpop.permute.xlu0 %394 }
 0x153   :  { %v474_v53 = vpop.permute.xlu1 %473  ;;  %v429_v18 = vrot.slane %v395_v6, %v400_v54 }
 0x154   :  { %v504_v24 = vrot.slane %v474_v53, %v400_v54 }
 0x157   :  { %v477_v57 = vpop.permute.xlu1 %476 }
 0x158   :  { %v508_v26 = vrot.slane %v477_v57, %v400_v54 }
 0x15b   :  { %v383_v60 = vpop.permute.xlu1 %382 }
 0x15c   :  { %v413_v63 = vrot.slane %v383_v60, %v400_v54 }
 0x15e   :  { %v435_v11 = vsel %vm434_vm5, %v413_v63, %v433_v2 }
 0x15f   :  { %v437_v5 = vsel %vm436_vm6, %v417_v3, %v435_v11  ;;  %v468_v15 = vpop.permute.xlu1 %467 }
 0x160   :  { %v496_v13 = vrot.slane %v468_v15, %v400_v54  ;;  %v439_v21 = vsel %vm438_vm7, %v421_v9, %v437_v5 }
 0x161   :  { %v441_v4 = vsel %vm440_vm8, %v425_v12, %v439_v21 }
 0x162   :  { %v515_v7 = vsel %vm434_vm5, %v496_v13, %v514_v23  ;;  %v443_v25 = vsel %vm442_vm9, %v429_v18, %v441_v4 }
 0x163   :  { %v516_v8 = vsel %vm436_vm6, %v500_v0, %v515_v7  ;;  %v480_v46 = vpop.permute.xlu1 %479  ;;  %v446_v30 = vsel %vm445_vm10, %v443_v25, inf }
 0x164   :  { %v512_v51 = vrot.slane %v480_v46, %v400_v54  ;;  %447 = vmin.xlane.f32.xlu0 %v446_v30  ;;  %v517_v31 = vsel %vm438_vm7, %v504_v24, %v516_v8 }
 0x165   :  { %v518_v32 = vsel %vm440_vm8, %v508_v26, %v517_v31 }
 0x166   :  { %v519_v33 = vsel %vm442_vm9, %v512_v51, %v518_v32 }
 0x167   :  { %v522_v29 = vsel %vm521_vm11, %v519_v33, -inf }
 0x168   :  { %523 = vmax.xlane.f32.xlu1 %v522_v29 }
 0x1f1   :  { %v448_v36 = vpop.xlane.xlu0 %447 }
 0x1f5   :  { %v524_v62 = vpop.xlane.xlu1 %523 }
 0x1f6   :  { %v525_v20 = vsub.f32 %v524_v62, %v448_v36 }
 0x1f8   :  { %v526_v19 = vadd.f32 0.3, %v525_v20 }
 0x1fa   :  { %v527_v37 = vmax.f32 %v526_v19, 0.0 }
 0x1fc   :  { %v534_v27 = vsel %vm533_vm12, %v527_v37, 0.0 }
 0x1fd   :  { %v536_v38 = vsel %vm535_vm13, %v534_v27, 0.0 }
 0x1fe   :  { %537 = vadd.xlane.f32.xlu0 %v536_v38 }
 0x28b   :  { %v538_v39 = vpop.xlane.xlu0 %537 }
 0x28c   :  { %v539_v28 = vrot.slane %v538_v39, 4 }
 0x28e   :  { %v540_v40 = vadd.f32 %v539_v28, %v538_v39 }
 0x290   :  { %v541_v43 = vrot.slane %v540_v40, 2 }
 0x292   :  { %v542_v17 = vadd.f32 %v541_v43, %v540_v40 }
 0x294   :  { %v543_v44 = vrot.slane %v542_v17, 1 }
 0x296   :  { %v544_v10 = vadd.f32 %v543_v44, %v542_v17 }
 0x298   :  { %562 = vpush %v544_v10 }
 0x2c9   :  { %s563_s18 = spop %562 }
 0x2ca   :  { %v546_v34 = vstv %s563_s18 }
 0x2cb   :  { %547 = vst [vmem:[#allocation2] sm:$0xff] %v546_v34 }
 0x2cc   :  { %615 = shalt.err (!%p612_p4)
}
 0x2cd   :  { %s616_s21 = scalar_lea.hbm %s912_s3, 128 }
 0x2ce   :  { %p617_p5 = scmp.ne.s32.totalorder %s912_s3, %s616_s21  ;;  %p620_p6 = scmp.lt.u32.totalorder %s616_s21, %s912_s3 }
 0x2d0   :  { %p622_p7 = pnand %p620_p6, %p617_p5 }
 0x2d2   :  { %625 = shalt.err (!%p622_p7)
}
 0x2d3   :  { %557 = dma.vmem_to_hbm [thread:$0]  %s555_s17, 128, %s912_s3, [#allocation3]  }
 0x2d4   :  { %626 = dma.done.wait [#allocation3], 128  }
 0x2d5   :  { %627 = vsyncadd [#allocation3], 4294967168 }
 0x2d6   :  { %561 = vsyncpa [#allocation3], 1 }

</bundles_post_ra>
